<compile_context>
chip_gen: v7x
topology: tpu7x:2x2x1
jax: 0.10.0
libtpu: 0.0.40
codegen_flags: <defaults>
</compile_context>

<pallas_src>
import jax
import jax.numpy as jnp
from jax.experimental import pallas as pl
from jax.experimental.pallas import tpu as pltpu


def _cdiv(a, b):
    return -(-a // b)


def _round_up(a, m):
    return _cdiv(a, m) * m


def _prototypes_kernel(x_ref, w_ref, o_ref):
    # x_ref: (tn, C_in)   natural point-feature tile
    # w_ref: (C_in, C_out) full 1x1x1-conv weight, resident across the grid
    # o_ref: (tn, C_out)  natural output tile (C_out == full dim, so legal block)
    o_ref[...] = jnp.dot(
        x_ref[...], w_ref[...], preferred_element_type=jnp.float32
    ).astype(o_ref.dtype)


def prototypes_forward(x_feats, weight, *, tn_max=8192, out_dtype=None):
    """Module-compatible entry point: Prototypes(x).F == x.F @ W.

    x_feats: (N, C_in)   feature matrix of the incoming sparse tensor (x.F)
    weight:  (C_in, C_out) MinkowskiConvolution kernel_size=1 weight (bias=False)
    out_dtype: None -> same dtype as x_feats.
               f32 features -> f32 output (module-exact).
               bf16 features -> bf16 output (recommended production setting:
               ~1.6x less HBM traffic for this memory-bound kernel).
    returns: (N, C_out)
    """
    N, C_in = x_feats.shape
    C_in_w, C_out = weight.shape
    assert C_in == C_in_w, (C_in, C_in_w)
    if out_dtype is None:
        out_dtype = x_feats.dtype

    # --- Tile / grid selection -------------------------------------------------
    # Bounded padding waste (< 128 rows per grid step) instead of padding N up to
    # a fixed multiple of tn, and >= 2 grid steps for mid-size N so the 1-D
    # "parallel" grid shards across both v7x TensorCores.
    grid_n = _cdiv(N, tn_max)
    if grid_n < 2 and N >= 256:
        grid_n = 2
    grid_n = max(grid_n, 1)
    tn = max(_round_up(_cdiv(N, grid_n), 128), 128)

    itemsize_x = jnp.dtype(x_feats.dtype).itemsize
    itemsize_w = jnp.dtype(weight.dtype).itemsize
    itemsize_o = jnp.dtype(out_dtype).itemsize
    cost = pl.CostEstimate(
        flops=2 * N * C_in * C_out,
        transcendentals=0,
        bytes_accessed=(N * C_in * itemsize_x
                        + C_in * C_out * itemsize_w
                        + N * C_out * itemsize_o),
    )

    return pl.pallas_call(
        _prototypes_kernel,
        out_shape=jax.ShapeDtypeStruct((N, C_out), out_dtype),
        grid_spec=pltpu.PrefetchScalarGridSpec(
            num_scalar_prefetch=0,
            grid=(grid_n,),
            in_specs=[
                # Ragged last block is masked by Pallas; padded rows only affect
                # output rows that are themselves masked on writeback.
                pl.BlockSpec((tn, C_in), lambda i: (i, 0)),
                pl.BlockSpec((C_in, C_out), lambda i: (0, 0)),  # tiny, reused
            ],
            out_specs=pl.BlockSpec((tn, C_out), lambda i: (i, 0)),
        ),
        compiler_params=pltpu.CompilerParams(
            dimension_semantics=("parallel",),   # megacore / v7x 2-TC sharding
            vmem_limit_bytes=32 * 1024 * 1024,   # tn<=8192 fits even in f32; raise if sweeping tn>=16384
        ),
        cost_estimate=cost,
    )(x_feats, weight)


if __name__ == "__main__":
    # Small, module-consistent shapes:
    #   output_dim (feature dim of incoming sparse tensor) = 32
    #   num_prototypes = 64
    #   N sparse points = 300 (deliberately ragged to exercise partial-block masking)
    output_dim = 32
    num_prototypes = 64
    n_points = 300

    key = jax.random.PRNGKey(0)
    kx, kw = jax.random.split(key)

    # Synthetic sparse-tensor features (what MinkowskiEngine would expose as x.F).
    x_feats = jax.random.normal(kx, (n_points, output_dim), dtype=jnp.float32)

    # Deterministic weight init for the 1x1x1 conv (kernel volume 1 -> (C_in, C_out)).
    fan_in = output_dim
    w = jax.random.uniform(
        kw, (output_dim, num_prototypes), dtype=jnp.float32,
        minval=-1.0, maxval=1.0,
    ) * (1.0 / jnp.sqrt(fan_in))

    # --- Module-exact path: f32 features -> f32 output -------------------------
    out = prototypes_forward(x_feats, w)
    out = jax.block_until_ready(out)
    assert out.shape == (n_points, num_prototypes)
    assert out.dtype == jnp.float32
    ref = x_feats @ w
    assert jnp.allclose(out, ref, atol=2e-2, rtol=2e-2)

    # --- Production fast path: bf16 features + weight -> bf16 output -----------
    xb = x_feats.astype(jnp.bfloat16)
    wb = w.astype(jnp.bfloat16)
    out_bf16 = jax.block_until_ready(prototypes_forward(xb, wb))
    assert out_bf16.shape == (n_points, num_prototypes)
    assert out_bf16.dtype == jnp.bfloat16
    ref_b = xb.astype(jnp.float32) @ wb.astype(jnp.float32)
    assert jnp.allclose(out_bf16.astype(jnp.float32), ref_b, atol=3e-2, rtol=3e-2)

    print("KERNEL_OK")
</pallas_src>

<mosaic_0001>
module attributes {stable_mosaic.version = 11 : i64} {
  func.func @_prototypes_kernel(%arg0: i32, %arg1: memref<256x32xf32, #tpu.memory_space<vmem>>, %arg2: memref<32x64xf32, #tpu.memory_space<vmem>>, %arg3: memref<256x64xf32, #tpu.memory_space<vmem>>) attributes {dimension_semantics = [#tpu.dimension_semantics<parallel>], iteration_bounds = array<i64: 2>, scalar_prefetch = 0 : i64, scratch_operands = 0 : i64, tpu.core_type = #tpu.core_type<tc>, window_params = [{transform_indices = @transform_0, window_bounds = array<i64: 256, 32>}, {pipeline_mode = #tpu.pipeline_mode<synchronous>, transform_indices = @transform_1, window_bounds = array<i64: 32, 64>}, {transform_indices = @transform_2, window_bounds = array<i64: 256, 64>}]} {
    %c0 = arith.constant 0 : index
    %c0_0 = arith.constant 0 : index
    %0 = vector.load %arg1[%c0, %c0_0] : memref<256x32xf32, #tpu.memory_space<vmem>>, vector<256x32xf32>
    %c0_1 = arith.constant 0 : index
    %c0_2 = arith.constant 0 : index
    %1 = vector.load %arg2[%c0_1, %c0_2] : memref<32x64xf32, #tpu.memory_space<vmem>>, vector<32x64xf32>
    %cst = arith.constant dense<0.000000e+00> : vector<256x64xf32>
    %2 = tpu.matmul %0, %1, %cst {dimension_numbers = #tpu.dot_dimension_numbers<[1], [0], [0], [1], [0, 0, 1, 1], [], []>} : vector<256x32xf32>, vector<32x64xf32>, vector<256x64xf32> -> vector<256x64xf32>
    %c0_3 = arith.constant 0 : index
    %c0_4 = arith.constant 0 : index
    %3 = vector.load %arg3[%c0_3, %c0_4] : memref<256x64xf32, #tpu.memory_space<vmem>>, vector<256x64xf32>
    tpu.vector_store %arg3[%c0_3, %c0_4], %2 {strides = array<i32>} : memref<256x64xf32, #tpu.memory_space<vmem>>, vector<256x64xf32>,
    return
  }
  func.func @transform_0(%arg0: i32) -> (i32, i32) {
    %c0_i32 = arith.constant 0 : i32
    %c0_i32_0 = arith.constant 0 : i32
    return %arg0, %c0_i32 : i32, i32
  }
  func.func @transform_1(%arg0: i32) -> (i32, i32) {
    %c0_i32 = arith.constant 0 : i32
    %c0_i32_0 = arith.constant 0 : i32
    %c0_i32_1 = arith.constant 0 : i32
    return %c0_i32, %c0_i32_0 : i32, i32
  }
  func.func @transform_2(%arg0: i32) -> (i32, i32) {
    %c0_i32 = arith.constant 0 : i32
    %c0_i32_0 = arith.constant 0 : i32
    return %arg0, %c0_i32 : i32, i32
  }
}

</mosaic_0001>

<bundles_post_ra>
// kernel: tpu_custom_call.1
= control target key start
LH: loop header
LB: loop body
LE: loop exit
PB: predicated region body
PF: predicated region fallthrough
CT: control target
= control target key end

     0   :  { %s1249_s9 = smov 0   ;;  %s1251_s10 = smov 0   ;;  %s1570_s0 = inlined_call_operand.vmem [shape: f32[300,32], index: 0, kind: input, shape index: {}]   ;;  %s1571_s1 = inlined_call_operand.vmem [shape: f32[32,64], index: 1, kind: input, shape index: {}]   ;;  %s1572_s2 = inlined_call_operand.vmem [shape: f32[300,64], index: 2, kind: output, shape index: {}]  }
   0x1   :  { %s1253_s11 = smov 0  }
   0x2 LB: > { %s1262_s12 = sadd.s32 4294967295, %s1200_s11   ;;  %s1264_s13 = sadd.s32 1, %s1200_s11   ;;  %s1200_s11 = sphi %s1253_s11, %s1581_s11   ;;  %s1196_s10 = sphi %s1251_s10, %s1580_s10   ;;  %s1192_s9 = sphi %s1249_s9, %s1579_s9  }
   0x3   : > { %s63_s14 = ssub.s32 %s1200_s11, %s1264_s13  ;;  %s66_s15 = sadd.s32 1, %s1196_s10 }
   0x4   : > { %p64_p0 = scmp.eq.s32.totalorder %s63_s14, 0  ;;  %p76_p1 = scmp.ne.s32.totalorder %s1196_s10, %s1192_s9 }
   0x5   : > { %p77_p2 = scmp.eq.s32.totalorder %s1262_s12, 1  ;;  %p898_p3 = scmp.ge.s32.totalorder %s1200_s11, 1 }
   0x6   : > { %s1272_s16 = scalar_select %p64_p0, %s1196_s10, %s66_s15  }
   0x7   : > { %p1274_p4 = por %p77_p2, %p76_p1  ;;  %p121_p5 = scmp.lt.s32.totalorder %s1200_s11, 3 }
   0x9   : > { %p122_p6 = pnand %p898_p3, %p121_p5 }
   0xa   : > { %v197_v0 = vld [vmem:[%s1571_s1] sm:$0xff] (!%p122_p6)  ;;  %v198_v1 = vld [vmem:[%s1571_s1 + $0x8] sm:$0xff] (!%p122_p6)  ;;  %v199_v2 = vld [vmem:[%s1571_s1 + $0x10] sm:$0xff] (!%p122_p6)  ;;  %s1288_s24 = sshll.u32 (!%p122_p6), %s1262_s12, 5  ;;  %vm201_vm0 = vcmask (!%p122_p6), 261120   ;;  %s143_s4 = sand.u32 (!%p122_p6), 1, %s1192_s9  }
   0xb   : > { %125 = sbr.rel (%p122_p6) target bundleno = 323 (0x143), region = 28  ;;  %v1046_v3 = vpack.c.bf16 (!%p122_p6), %v198_v1, %v197_v0  ;;  %v200_v4 = vld [vmem:[%s1571_s1 + $0x18] sm:$0xff] (!%p122_p6)  ;;  %p151_p7 = scmp.lt.s32.totalorder (!%p122_p6), %s1288_s24, 37  ;;  %vm523_vm1 = vcmask (!%p122_p6), 523264  }
   0xc   : > { %v1050_v5 = vpack.c.bf16 (!%p122_p6), %v200_v4, %v199_v2  ;;  %s899_s5 = sshll.u32 (!%p122_p6), %s143_s4, 8 }
   0xd   : > { %1047 = vmatprep.subr.bf16.mxu0 (!%p122_p6), %v1046_v3  ;;  %1054 = vmatprep.subr.bf16.mxu1 (!%p122_p6), %v1046_v3  ;;  %s1365_s6 = scalar_lea.vmem (!%p122_p6), [#allocation2], %s899_s5  }
   0xe   : > { %1049 = vmatpush3.bf16.msra.mxu0 (!%p122_p6), %v1046_v3  ;;  %1056 = vmatpush3.bf16.msra.mxu1 (!%p122_p6), %v1046_v3 }
   0xf   : > { %1051 = vmatprep.subr.bf16.mxu0 (!%p122_p6), %v1050_v5  ;;  %1055 = vmatprep.subr.bf16.mxu1 (!%p122_p6), %v1050_v5 }
  0x12   : > { %s152_s27 = scalar_select %p151_p7, %s1288_s24, 37  ;;  %1053 = vmatpush3.bf16.msra.mxu0 %v1050_v5  ;;  %1057 = vmatpush3.bf16.msra.mxu1 %v1050_v5 }
  0x13   : > { %s564_s7 = ssub.s32 (%p1274_p4), 38, %s1288_s24  ;;  %s951_s8 = sshll.u32 (%p1274_p4), %s1262_s12, 8 }
  0x14   : > { %s901_s28 = sshll.u32 %s152_s27, 3  ;;  %p565_p8 = scmp.lt.s32.totalorder (%p1274_p4), %s564_s7, 32 }
  0x15   : > { %s1298_s3 = scalar_lea.vmem %s1570_s0, %s901_s28  ;;  %s1438_s14 = scalar_lea.vmem (%p1274_p4), %s1572_s2, %s951_s8  }
  0x16   : > { %v165_v6 = vld [vmem:[%s1298_s3] sm:$0xff]  ;;  %v166_v8 = vld [vmem:[%s1298_s3 + $0x8] sm:$0xff]  ;;  %v167_v10 = vld [vmem:[%s1298_s3 + $0x10] sm:$0xff] }
  0x17   : > { %v181_v7 = vld [vmem:[%s1298_s3 + $0x80] sm:$0xff]  ;;  %v182_v9 = vld [vmem:[%s1298_s3 + $0x88] sm:$0xff]  ;;  %998 = vmatprep.mubr.msk.f32.mxu0 %vm201_vm0, %v165_v6  ;;  %v183_v11 = vld [vmem:[%s1298_s3 + $0x90] sm:$0xff] }
  0x18   : > { %1022 = vmatprep.mubr.msk.f32.mxu1 %vm201_vm0, %v181_v7  ;;  %999 = vmatmul.mubr.msk.f32.vlgmr.msra.gmra.mrb[0].mxu0 %vm201_vm0, %v166_v8  ;;  %v168_v12 = vld [vmem:[%s1298_s3 + $0x18] sm:$0xff]  ;;  %v169_v14 = vld [vmem:[%s1298_s3 + $0x20] sm:$0xff]  ;;  %v170_v16 = vld [vmem:[%s1298_s3 + $0x28] sm:$0xff] }
  0x19   : > { %1023 = vmatmul.mubr.msk.f32.vlgmr.msra.gmra.mrb[0].mxu1 %vm201_vm0, %v182_v9  ;;  %1001 = vmatprep.mubr.msk.f32.mxu0 %vm201_vm0, %v167_v10  ;;  %v184_v13 = vld [vmem:[%s1298_s3 + $0x98] sm:$0xff]  ;;  %v185_v15 = vld [vmem:[%s1298_s3 + $0xa0] sm:$0xff]  ;;  %v186_v17 = vld [vmem:[%s1298_s3 + $0xa8] sm:$0xff] }
  0x1a   : > { %1025 = vmatprep.mubr.msk.f32.mxu1 %vm201_vm0, %v183_v11  ;;  %v171_v18 = vld [vmem:[%s1298_s3 + $0x30] sm:$0xff]  ;;  %v172_v20 = vld [vmem:[%s1298_s3 + $0x38] sm:$0xff]  ;;  %v173_v22 = vld [vmem:[%s1298_s3 + $0x40] sm:$0xff] }
  0x1b   : > { %v187_v19 = vld [vmem:[%s1298_s3 + $0xb0] sm:$0xff]  ;;  %v188_v21 = vld [vmem:[%s1298_s3 + $0xb8] sm:$0xff]  ;;  %v189_v23 = vld [vmem:[%s1298_s3 + $0xc0] sm:$0xff] }
  0x1c   : > { %1002 = vmatmul.mubr.msk.f32.gmra.mrb[2].mxu0 %vm201_vm0, %v168_v12  ;;  %v174_v24 = vld [vmem:[%s1298_s3 + $0x48] sm:$0xff]  ;;  %v175_v26 = vld [vmem:[%s1298_s3 + $0x50] sm:$0xff]  ;;  %v176_v28 = vld [vmem:[%s1298_s3 + $0x58] sm:$0xff] }
  0x1d   : > { %1026 = vmatmul.mubr.msk.f32.gmra.mrb[2].mxu1 %vm201_vm0, %v184_v13  ;;  %1004 = vmatprep.mubr.msk.f32.mxu0 %vm201_vm0, %v169_v14  ;;  %v190_v25 = vld [vmem:[%s1298_s3 + $0xc8] sm:$0xff]  ;;  %v191_v27 = vld [vmem:[%s1298_s3 + $0xd0] sm:$0xff]  ;;  %v192_v29 = vld [vmem:[%s1298_s3 + $0xd8] sm:$0xff] }
  0x1e   : > { %1028 = vmatprep.mubr.msk.f32.mxu1 %vm201_vm0, %v185_v15  ;;  %v177_v30 = vld [vmem:[%s1298_s3 + $0x60] sm:$0xff]  ;;  %v178_v32 = vld [vmem:[%s1298_s3 + $0x68] sm:$0xff]  ;;  %v179_v34 = vld [vmem:[%s1298_s3 + $0x70] sm:$0xff] }
  0x1f   : > { %v193_v31 = vld [vmem:[%s1298_s3 + $0xe0] sm:$0xff]  ;;  %v194_v33 = vld [vmem:[%s1298_s3 + $0xe8] sm:$0xff]  ;;  %v195_v35 = vld [vmem:[%s1298_s3 + $0xf0] sm:$0xff] }
  0x20   : > { %1005 = vmatmul.mubr.msk.f32.gmra.mrb[4].mxu0 %vm201_vm0, %v170_v16  ;;  %v180_v36 = vld [vmem:[%s1298_s3 + $0x78] sm:$0xff] }
  0x21   : > { %1029 = vmatmul.mubr.msk.f32.gmra.mrb[4].mxu1 %vm201_vm0, %v186_v17  ;;  %1007 = vmatprep.mubr.msk.f32.mxu0 %vm201_vm0, %v171_v18  ;;  %v196_v37 = vld [vmem:[%s1298_s3 + $0xf8] sm:$0xff] }
  0x22   : > { %1031 = vmatprep.mubr.msk.f32.mxu1 %vm201_vm0, %v187_v19 }
  0x24   : > { %1008 = vmatmul.mubr.msk.f32.gmra.mrb[6].mxu0 %vm201_vm0, %v172_v20 }
  0x25   : > { %1032 = vmatmul.mubr.msk.f32.gmra.mrb[6].mxu1 %vm201_vm0, %v188_v21  ;;  %1010 = vmatprep.mubr.msk.f32.mxu0 %vm201_vm0, %v173_v22 }
  0x26   : > { %1034 = vmatprep.mubr.msk.f32.mxu1 %vm201_vm0, %v189_v23 }
  0x28   : > { %1011 = vmatmul.mubr.msk.f32.gmra.mrb[8].mxu0 %vm201_vm0, %v174_v24 }
  0x29   : > { %1035 = vmatmul.mubr.msk.f32.gmra.mrb[8].mxu1 %vm201_vm0, %v190_v25  ;;  %1013 = vmatprep.mubr.msk.f32.mxu0 %vm201_vm0, %v175_v26 }
  0x2a   : > { %1037 = vmatprep.mubr.msk.f32.mxu1 %vm201_vm0, %v191_v27 }
  0x2c   : > { %1014 = vmatmul.mubr.msk.f32.gmra.mrb[10].mxu0 %vm201_vm0, %v176_v28 }
  0x2d   : > { %1038 = vmatmul.mubr.msk.f32.gmra.mrb[10].mxu1 %vm201_vm0, %v192_v29  ;;  %1016 = vmatprep.mubr.msk.f32.mxu0 %vm201_vm0, %v177_v30 }
  0x2e   : > { %1040 = vmatprep.mubr.msk.f32.mxu1 %vm201_vm0, %v193_v31 }
  0x30   : > { %1017 = vmatmul.mubr.msk.f32.gmra.mrb[12].mxu0 %vm201_vm0, %v178_v32 }
  0x31   : > { %1041 = vmatmul.mubr.msk.f32.gmra.mrb[12].mxu1 %vm201_vm0, %v194_v33  ;;  %1019 = vmatprep.mubr.msk.f32.mxu0 %vm201_vm0, %v179_v34 }
  0x32   : > { %1043 = vmatprep.mubr.msk.f32.mxu1 %vm201_vm0, %v195_v35 }
  0x34   : > { %1020 = vmatmul.mubr.msk.f32.gmra.mrb[14].mxu0 %vm201_vm0, %v180_v36 }
  0x35   : > { %1044 = vmatmul.mubr.msk.f32.gmra.mrb[14].mxu1 %vm201_vm0, %v196_v37 }
  0xeb   : > { %v1000_v38 = vpop.f32.mrb[0].mxu0 }
  0xec   : > { %v1024_v39 = vpop.f32.mrb[0].mxu1  ;;  %525 = vst.msk [vmem:[%s1365_s6 + $0x8] sm:$0xff] %vm523_vm1, %v1000_v38  ;;  %v364_v40 = vpop.f32.mrb[1].mxu0 }
  0xed   : > { %541 = vst.msk [vmem:[%s1365_s6 + $0x88] sm:$0xff] %vm523_vm1, %v1024_v39  ;;  %v444_v41 = vpop.f32.mrb[1].mxu1  ;;  %524 = vst.msk [vmem:[%s1365_s6] sm:$0xff] %vm523_vm1, %v364_v40 }
  0xee   : > { %540 = vst.msk [vmem:[%s1365_s6 + $0x80] sm:$0xff] %vm523_vm1, %v444_v41 }
  0xef   : > { %v1003_v42 = vpop.f32.mrb[2].mxu0 }
  0xf0   : > { %v1027_v43 = vpop.f32.mrb[2].mxu1  ;;  %527 = vst.msk [vmem:[%s1365_s6 + $0x18] sm:$0xff] %vm523_vm1, %v1003_v42  ;;  %v374_v44 = vpop.f32.mrb[3].mxu0 }
  0xf1   : > { %543 = vst.msk [vmem:[%s1365_s6 + $0x98] sm:$0xff] %vm523_vm1, %v1027_v43  ;;  %v454_v45 = vpop.f32.mrb[3].mxu1  ;;  %526 = vst.msk [vmem:[%s1365_s6 + $0x10] sm:$0xff] %vm523_vm1, %v374_v44 }
  0xf2   : > { %542 = vst.msk [vmem:[%s1365_s6 + $0x90] sm:$0xff] %vm523_vm1, %v454_v45 }
  0xf3   : > { %v1006_v46 = vpop.f32.mrb[4].mxu0 }
  0xf4   : > { %v1030_v47 = vpop.f32.mrb[4].mxu1  ;;  %529 = vst.msk [vmem:[%s1365_s6 + $0x28] sm:$0xff] %vm523_vm1, %v1006_v46  ;;  %v384_v48 = vpop.f32.mrb[5].mxu0 }
  0xf5   : > { %545 = vst.msk [vmem:[%s1365_s6 + $0xa8] sm:$0xff] %vm523_vm1, %v1030_v47  ;;  %v464_v49 = vpop.f32.mrb[5].mxu1  ;;  %528 = vst.msk [vmem:[%s1365_s6 + $0x20] sm:$0xff] %vm523_vm1, %v384_v48 }
  0xf6   : > { %544 = vst.msk [vmem:[%s1365_s6 + $0xa0] sm:$0xff] %vm523_vm1, %v464_v49 }
  0xf7   : > { %v1009_v50 = vpop.f32.mrb[6].mxu0 }
  0xf8   : > { %v1033_v51 = vpop.f32.mrb[6].mxu1  ;;  %531 = vst.msk [vmem:[%s1365_s6 + $0x38] sm:$0xff] %vm523_vm1, %v1009_v50  ;;  %v394_v52 = vpop.f32.mrb[7].mxu0 }
  0xf9   : > { %547 = vst.msk [vmem:[%s1365_s6 + $0xb8] sm:$0xff] %vm523_vm1, %v1033_v51  ;;  %v474_v53 = vpop.f32.mrb[7].mxu1  ;;  %530 = vst.msk [vmem:[%s1365_s6 + $0x30] sm:$0xff] %vm523_vm1, %v394_v52 }
  0xfa   : > { %546 = vst.msk [vmem:[%s1365_s6 + $0xb0] sm:$0xff] %vm523_vm1, %v474_v53 }
  0xfb   : > { %v1012_v54 = vpop.f32.mrb[8].mxu0 }
  0xfc   : > { %v1036_v55 = vpop.f32.mrb[8].mxu1  ;;  %533 = vst.msk [vmem:[%s1365_s6 + $0x48] sm:$0xff] %vm523_vm1, %v1012_v54  ;;  %v404_v56 = vpop.f32.mrb[9].mxu0 }
  0xfd   : > { %549 = vst.msk [vmem:[%s1365_s6 + $0xc8] sm:$0xff] %vm523_vm1, %v1036_v55  ;;  %v484_v57 = vpop.f32.mrb[9].mxu1  ;;  %532 = vst.msk [vmem:[%s1365_s6 + $0x40] sm:$0xff] %vm523_vm1, %v404_v56 }
  0xfe   : > { %548 = vst.msk [vmem:[%s1365_s6 + $0xc0] sm:$0xff] %vm523_vm1, %v484_v57 }
  0xff   : > { %v1015_v58 = vpop.f32.mrb[10].mxu0 }
 0x100   : > { %v1039_v59 = vpop.f32.mrb[10].mxu1  ;;  %535 = vst.msk [vmem:[%s1365_s6 + $0x58] sm:$0xff] %vm523_vm1, %v1015_v58  ;;  %v414_v60 = vpop.f32.mrb[11].mxu0 }
 0x101   : > { %551 = vst.msk [vmem:[%s1365_s6 + $0xd8] sm:$0xff] %vm523_vm1, %v1039_v59  ;;  %v494_v61 = vpop.f32.mrb[11].mxu1  ;;  %534 = vst.msk [vmem:[%s1365_s6 + $0x50] sm:$0xff] %vm523_vm1, %v414_v60 }
 0x102   : > { %550 = vst.msk [vmem:[%s1365_s6 + $0xd0] sm:$0xff] %vm523_vm1, %v494_v61 }
 0x103   : > { %v1018_v62 = vpop.f32.mrb[12].mxu0 }
 0x104   : > { %v1042_v63 = vpop.f32.mrb[12].mxu1  ;;  %537 = vst.msk [vmem:[%s1365_s6 + $0x68] sm:$0xff] %vm523_vm1, %v1018_v62  ;;  %v424_v0 = vpop.f32.mrb[13].mxu0  ;;  %562 = sbr.rel (!%p1274_p4) target bundleno = 323 (0x143), region = 32 }
 0x105   : > { %553 = vst.msk [vmem:[%s1365_s6 + $0xe8] sm:$0xff] %vm523_vm1, %v1042_v63  ;;  %v504_v1 = vpop.f32.mrb[13].mxu1  ;;  %536 = vst.msk [vmem:[%s1365_s6 + $0x60] sm:$0xff] %vm523_vm1, %v424_v0 }
 0x106   : > { %552 = vst.msk [vmem:[%s1365_s6 + $0xe0] sm:$0xff] %vm523_vm1, %v504_v1 }
 0x107   : > { %v1021_v2 = vpop.f32.mrb[14].mxu0 }
 0x108   : > { %v1045_v3 = vpop.f32.mrb[14].mxu1  ;;  %539 = vst.msk [vmem:[%s1365_s6 + $0x78] sm:$0xff] %vm523_vm1, %v1021_v2  ;;  %v434_v4 = vpop.f32.mrb[15].mxu0 }
 0x109   : > { %555 = vst.msk [vmem:[%s1365_s6 + $0xf8] sm:$0xff] %vm523_vm1, %v1045_v3  ;;  %v514_v5 = vpop.f32.mrb[15].mxu1  ;;  %538 = vst.msk [vmem:[%s1365_s6 + $0x70] sm:$0xff] %vm523_vm1, %v434_v4 }
 0x10a   : > { %554 = vst.msk [vmem:[%s1365_s6 + $0xf0] sm:$0xff] %vm523_vm1, %v514_v5 }
 0x10b   : > { %s1583_s7 = smov (!%p565_p8, %s564_s7), 32 }
 0x10c   : > { %s936_s15 = sshll.u32 %s1583_s7, 7 }
 0x10d   : > { %p939_p9 = scmp.eq.s32.totalorder %s936_s15, 0 }
 0x10e   : > { %s1444_s18 = sshrl.u32 (!%p939_p9), %s1583_s7, 5 }
 0x10f   : > { %573 = sbr.rel (%p939_p9) target bundleno = 323 (0x143), region = 36  ;;  %p940_p10 = scmp.le.s32.totalorder (!%p939_p9), %s1444_s18, 0 }
 0x116   : > { %851 = sbr.rel (%p940_p10) target bundleno = 302 (0x12e), region = 112  ;;  %s1574_s12 = smov (!%p940_p10), %s1438_s14 }
 0x117   : > { %s1575_s17 = smov (!%p940_p10), %s1365_s6  ;;  %s1453_s19 = smov (!%p940_p10), 0  }
 0x118   : > { %s1455_s20 = smov (!%p940_p10), 0  }
 0x11d LB: >> { %v697_v6 = vld [vmem:[%s1208_s17] sm:$0xff]  ;;  %v699_v7 = vld [vmem:[%s1208_s17 + $0x8] sm:$0xff]  ;;  %v701_v8 = vld [vmem:[%s1208_s17 + $0x10] sm:$0xff]  ;;  %s761_s21 = sadd.s32 1, %s1212_s19  ;;  %s691_s20 = sadd.s32 1, %s1216_s20   ;;  %s1216_s20 = sphi %s1455_s20, %s691_s20   ;;  %s1212_s19 = sphi %s1453_s19, %s1578_s19   ;;  %s1208_s17 = sphi %s1575_s17, %s1577_s17   ;;  %s1204_s12 = sphi %s1574_s12, %s1576_s12  }
 0x11e   : >> { %698 = vst [vmem:[%s1204_s12] sm:$0xff] %v697_v6  ;;  %700 = vst [vmem:[%s1204_s12 + $0x8] sm:$0xff] %v699_v7  ;;  %v703_v9 = vld [vmem:[%s1208_s17 + $0x18] sm:$0xff]  ;;  %v705_v10 = vld [vmem:[%s1208_s17 + $0x20] sm:$0xff]  ;;  %p762_p11 = scmp.ge.s32.totalorder %s761_s21, %s1444_s18  ;;  %p690_p12 = scmp.ge.s32.totalorder %s691_s20, %s1444_s18 }
 0x11f   : >> { %702 = vst [vmem:[%s1204_s12 + $0x10] sm:$0xff] %v701_v8  ;;  %v707_v11 = vld [vmem:[%s1208_s17 + $0x28] sm:$0xff]  ;;  %704 = vst [vmem:[%s1204_s12 + $0x18] sm:$0xff] %v703_v9  ;;  %v709_v12 = vld [vmem:[%s1208_s17 + $0x30] sm:$0xff] }
 0x120   : >> { %706 = vst [vmem:[%s1204_s12 + $0x20] sm:$0xff] %v705_v10  ;;  %708 = vst [vmem:[%s1204_s12 + $0x28] sm:$0xff] %v707_v11  ;;  %v711_v13 = vld [vmem:[%s1208_s17 + $0x38] sm:$0xff]  ;;  %v713_v14 = vld [vmem:[%s1208_s17 + $0x40] sm:$0xff]  ;;  %s1585_s21 = smov (%p762_p11, %s761_s21), 0 }
 0x121   : >> { %710 = vst [vmem:[%s1204_s12 + $0x30] sm:$0xff] %v709_v12  ;;  %712 = vst [vmem:[%s1204_s12 + $0x38] sm:$0xff] %v711_v13  ;;  %v715_v15 = vld [vmem:[%s1208_s17 + $0x48] sm:$0xff]  ;;  %v717_v16 = vld [vmem:[%s1208_s17 + $0x50] sm:$0xff]  ;;  %s941_s22 = sshll.u32 %s1585_s21, 8  ;;  %s1578_s19 = smov %s1585_s21 }
 0x122   : >> { %714 = vst [vmem:[%s1204_s12 + $0x40] sm:$0xff] %v713_v14  ;;  %v719_v17 = vld [vmem:[%s1208_s17 + $0x58] sm:$0xff]  ;;  %716 = vst [vmem:[%s1204_s12 + $0x48] sm:$0xff] %v715_v15  ;;  %v721_v18 = vld [vmem:[%s1208_s17 + $0x60] sm:$0xff]  ;;  %s1511_s23 = scalar_lea.vmem %s1365_s6, %s941_s22 [#allocation2]   ;;  %s767_s24 = scalar_lea.vmem %s1438_s14, %s941_s22  }
 0x123   : >> { %718 = vst [vmem:[%s1204_s12 + $0x50] sm:$0xff] %v717_v16  ;;  %720 = vst [vmem:[%s1204_s12 + $0x58] sm:$0xff] %v719_v17  ;;  %v723_v19 = vld [vmem:[%s1208_s17 + $0x68] sm:$0xff]  ;;  %v725_v20 = vld [vmem:[%s1208_s17 + $0x70] sm:$0xff] }
 0x124   : >> { %722 = vst [vmem:[%s1204_s12 + $0x60] sm:$0xff] %v721_v18  ;;  %724 = vst [vmem:[%s1204_s12 + $0x68] sm:$0xff] %v723_v19  ;;  %v727_v21 = vld [vmem:[%s1208_s17 + $0x78] sm:$0xff]  ;;  %v729_v22 = vld [vmem:[%s1208_s17 + $0x80] sm:$0xff] }
 0x125   : >> { %726 = vst [vmem:[%s1204_s12 + $0x70] sm:$0xff] %v725_v20  ;;  %v731_v23 = vld [vmem:[%s1208_s17 + $0x88] sm:$0xff]  ;;  %728 = vst [vmem:[%s1204_s12 + $0x78] sm:$0xff] %v727_v21  ;;  %v733_v24 = vld [vmem:[%s1208_s17 + $0x90] sm:$0xff] }
 0x126   : >> { %730 = vst [vmem:[%s1204_s12 + $0x80] sm:$0xff] %v729_v22  ;;  %732 = vst [vmem:[%s1204_s12 + $0x88] sm:$0xff] %v731_v23  ;;  %v735_v25 = vld [vmem:[%s1208_s17 + $0x98] sm:$0xff]  ;;  %v737_v26 = vld [vmem:[%s1208_s17 + $0xa0] sm:$0xff] }
 0x127   : >> { %734 = vst [vmem:[%s1204_s12 + $0x90] sm:$0xff] %v733_v24  ;;  %736 = vst [vmem:[%s1204_s12 + $0x98] sm:$0xff] %v735_v25  ;;  %v739_v27 = vld [vmem:[%s1208_s17 + $0xa8] sm:$0xff]  ;;  %v741_v28 = vld [vmem:[%s1208_s17 + $0xb0] sm:$0xff]  ;;  %693 = sbr.rel (!%p690_p12) target bundleno = 285 (0x11d), region = 118 }
 0x128   : >> { %738 = vst [vmem:[%s1204_s12 + $0xa0] sm:$0xff] %v737_v26  ;;  %v743_v29 = vld [vmem:[%s1208_s17 + $0xb8] sm:$0xff]  ;;  %740 = vst [vmem:[%s1204_s12 + $0xa8] sm:$0xff] %v739_v27  ;;  %v745_v30 = vld [vmem:[%s1208_s17 + $0xc0] sm:$0xff] }
 0x129   : >> { %742 = vst [vmem:[%s1204_s12 + $0xb0] sm:$0xff] %v741_v28  ;;  %744 = vst [vmem:[%s1204_s12 + $0xb8] sm:$0xff] %v743_v29  ;;  %v747_v31 = vld [vmem:[%s1208_s17 + $0xc8] sm:$0xff]  ;;  %v749_v32 = vld [vmem:[%s1208_s17 + $0xd0] sm:$0xff] }
 0x12a   : >> { %746 = vst [vmem:[%s1204_s12 + $0xc0] sm:$0xff] %v745_v30  ;;  %748 = vst [vmem:[%s1204_s12 + $0xc8] sm:$0xff] %v747_v31  ;;  %v751_v33 = vld [vmem:[%s1208_s17 + $0xd8] sm:$0xff]  ;;  %v753_v34 = vld [vmem:[%s1208_s17 + $0xe0] sm:$0xff] }
 0x12b   : >> { %750 = vst [vmem:[%s1204_s12 + $0xd0] sm:$0xff] %v749_v32  ;;  %v755_v35 = vld [vmem:[%s1208_s17 + $0xe8] sm:$0xff]  ;;  %752 = vst [vmem:[%s1204_s12 + $0xd8] sm:$0xff] %v751_v33  ;;  %v757_v36 = vld [vmem:[%s1208_s17 + $0xf0] sm:$0xff] }
 0x12c   : >> { %754 = vst [vmem:[%s1204_s12 + $0xe0] sm:$0xff] %v753_v34  ;;  %756 = vst [vmem:[%s1204_s12 + $0xe8] sm:$0xff] %v755_v35  ;;  %v759_v37 = vld [vmem:[%s1208_s17 + $0xf8] sm:$0xff]  ;;  %s1577_s17 = smov %s1511_s23 }
 0x12d   : >> { %758 = vst [vmem:[%s1204_s12 + $0xf0] sm:$0xff] %v757_v36  ;;  %760 = vst [vmem:[%s1204_s12 + $0xf8] sm:$0xff] %v759_v37  ;;  %s1576_s12 = smov %s767_s24 }
 0x12e PF: > { %s1552_s25 = sand.u32 31, %s1583_s7   ;;  %s952_s26 = sshll.u32 %s1444_s18, 8 }
 0x12f   : > { %s772_s27 = scalar_lea.vmem %s1365_s6, %s952_s26 [#allocation2]   ;;  %s774_s28 = scalar_lea.vmem %s1438_s14, %s952_s26  }
 0x130   : > { %p946_p13 = scmp.le.s32.totalorder %s1552_s25, 0 }
 0x131   : > { %s1218_s29 = smov (!%p946_p13), %s774_s28   ;;  %s1222_s30 = smov (!%p946_p13), %s772_s27  }
 0x132   : > { %865 = sbr.rel (%p946_p13) target bundleno = 323 (0x143), region = 123  ;;  %s1226_s3 = smov (!%p946_p13), 0  }
 0x133   : > { %s1230_s4 = smov (!%p946_p13), 0  }
 0x139 LB: >> { %v784_v38 = vld [vmem:[%s1224_s30] sm:$0xff]  ;;  %s786_s5 = sadd.s32 1, %s1228_s3  ;;  %s778_s4 = sadd.s32 1, %s1232_s4   ;;  %s1232_s4 = sphi %s1230_s4, %s778_s4   ;;  %s1228_s3 = sphi %s1226_s3, %s1227_s3   ;;  %s1224_s30 = sphi %s1222_s30, %s791_s30   ;;  %s1220_s29 = sphi %s1218_s29, %s792_s29  }
 0x13a   : >> { %785 = vst [vmem:[%s1220_s29] sm:$0xff] %v784_v38  ;;  %p787_p0 = scmp.ge.s32.totalorder %s786_s5, %s1552_s25  ;;  %p777_p1 = scmp.ge.s32.totalorder %s778_s4, %s1552_s25 }
 0x13c   : >> { %s1587_s5 = smov (%p787_p0, %s786_s5), 0  ;;  %780 = sbr.rel (!%p777_p1) target bundleno = 313 (0x139), region = 129 }
 0x13d   : >> { %s947_s6 = sshll.u32 %s1587_s5, 3  ;;  %s1227_s3 = smov %s1587_s5  }
 0x13e   : >> { %s791_s30 = scalar_lea.vmem %s772_s27, %s947_s6 [#allocation2]   ;;  %s792_s29 = scalar_lea.vmem %s774_s28, %s947_s6  }
 0x143 PF: > { %p9_p2 = scmp.ge.s32.totalorder %s1264_s13, 4   ;;  %s1579_s9 = smov %s1196_s10 }
 0x144   : > { %s1580_s10 = smov %s1272_s16  ;;  %s1581_s11 = smov %s1264_s13 }
 0x145   :  { %11 = sbr.rel (!%p9_p2) target bundleno = 2 (0x2), region = 140 }

</bundles_post_ra>
